<compile_context>
chip_gen: v7x
topology: tpu7x:2x2x1
jax: 0.10.0
libtpu: 0.0.40
codegen_flags: <defaults>
</compile_context>

<pallas_src>
import functools

import jax
import jax.numpy as jnp
from jax.experimental import pallas as pl
from jax.experimental.pallas import tpu as pltpu


def _ce2d_kernel(x_ref, t_ref, out_ref, *, hw):
    """One grid step.

    x_ref : (BN, C, T) logits tile (channels on sublanes, spatial on lanes)
    t_ref : (BN, 1, T) int32 target tile
    out_ref: (1, 1, 1, 1) partial-sum block owned by this grid step.

    Columns whose global spatial index >= hw (ragged last tile) are masked
    out and contribute exactly 0 (the OOB lanes hold undefined data).
    """
    x = x_ref[...].astype(jnp.float32)              # (BN, C, T)
    t = t_ref[...]                                  # (BN, 1, T) int32
    bn, c, tt = x.shape

    # Numerically stable log-sum-exp over the channel (sublane) axis.
    m = jnp.max(x, axis=1, keepdims=True)                                # (BN,1,T)
    lse = jnp.log(jnp.sum(jnp.exp(x - m), axis=1, keepdims=True))        # (BN,1,T)

    # Fused target gather: (1, C, 1) class iota broadcasts against targets;
    # gather directly from x (loss = (m + lse) - picked_x, same math).
    ch = jax.lax.broadcasted_iota(jnp.int32, (1, c, 1), 1)               # (1,C,1)
    picked = jnp.sum(jnp.where(ch == t, x, 0.0), axis=1, keepdims=True)  # (BN,1,T)

    # Mask columns that lie past the real spatial extent (ragged last tile).
    col = (pl.program_id(1) * tt
           + jax.lax.broadcasted_iota(jnp.int32, (1, 1, tt), 2))         # (1,1,T)
    valid = col < hw

    loss = jnp.where(valid, (m + lse) - picked, 0.0)                     # (BN,1,T)
    out_ref[...] = jnp.sum(loss).reshape(1, 1, 1, 1)


def cross_entropy_loss_2d(outputs, targets, *,
                          target_block_bytes=4 << 20,
                          vmem_limit_bytes=32 << 20):
    """outputs: (N, C, H, W) float, targets: (N, H, W) int -> scalar f32 loss.

    Equivalent to nn.NLLLoss()(F.log_softmax(outputs, dim=1), targets)
    (mean reduction, weight=None, all targets assumed in [0, C)).
    """
    # TODO(synk): per-class `weight` and ignore_index semantics of nn.NLLLoss
    # are not implemented (ignored pixels would need to be dropped from both
    # numerator and denominator).
    N, C, H, W = outputs.shape
    HW = H * W
    rows = N * HW

    LANE = 128
    itemsize = jnp.dtype(outputs.dtype).itemsize

    # Sublane packing granularity of the logits dtype (f32:8, bf16:16, int8:32).
    sub = 8 * max(1, 4 // itemsize)
    c_pad = ((C + sub - 1) // sub) * sub

    # Bytes per (batch-row, spatial-column):
    hbm_per_col = C * itemsize + 4                    # streamed from HBM
    vmem_per_col = c_pad * itemsize + 8 * 4           # in VMEM (sublane-padded)

    # Desired columns per grid step (~target_block_bytes of streamed data),
    # capped so 2 pipeline buffers of (logits + targets) fit in VMEM.
    want_cols = max(LANE, target_block_bytes // hbm_per_col)
    vmem_budget = (vmem_limit_bytes * 5) // 8
    max_cols = max(LANE, vmem_budget // (2 * vmem_per_col))
    want_cols = min(want_cols, max_cols)

    if HW >= want_cols:
        # Large spatial extent: tile the spatial axis only.
        bn = 1
        t_hw = max(LANE, (want_cols // LANE) * LANE)  # multiple of 128
    else:
        # Small spatial extent: take whole rows and fold batch into the block.
        t_hw = HW                                     # equals full dim -> legal
        bn = min(N, max(1, want_cols // max(HW, 1)))
        while N % bn:                                 # keep batch tiles exact
            bn -= 1

    n_bt = N // bn
    n_ct = pl.cdiv(HW, t_hw)

    # Free reshapes of the contiguous NCHW tensor (channels stay in place).
    x = outputs.reshape(N, C, HW)
    t = targets.reshape(N, 1, HW).astype(jnp.int32)

    cost = pl.CostEstimate(
        flops=rows * (5 * C + 4),
        transcendentals=rows * (C + 1),
        bytes_accessed=N * C * HW * itemsize + N * HW * 4 + n_bt * n_ct * 4,
    )

    kernel = functools.partial(_ce2d_kernel, hw=HW)

    partials = pl.pallas_call(
        kernel,
        out_shape=jax.ShapeDtypeStruct((n_bt, n_ct, 1, 1), jnp.float32),
        grid_spec=pltpu.PrefetchScalarGridSpec(
            num_scalar_prefetch=0,
            grid=(n_bt, n_ct),
            in_specs=[
                # (bn, C, t_hw) logits tile: channels on sublanes, spatial on lanes.
                pl.BlockSpec((bn, C, t_hw), lambda i, j: (i, 0, j)),
                # (bn, 1, t_hw) lane-dense int32 target tile.
                pl.BlockSpec((bn, 1, t_hw), lambda i, j: (i, 0, j)),
            ],
            # Each grid step owns its own partial-sum block -> fully parallel.
            out_specs=pl.BlockSpec((1, 1, 1, 1), lambda i, j: (i, j, 0, 0)),
        ),
        compiler_params=pltpu.CompilerParams(
            dimension_semantics=("parallel", "parallel"),
            vmem_limit_bytes=vmem_limit_bytes,
        ),
        cost_estimate=cost,
    )(x, t)

    # Mean reduction over all pixels.
    return jnp.sum(partials) / jnp.float32(rows)


def _reference(outputs, targets):
    # Pure-JAX reference of F.log_softmax(outputs, dim=1) + NLLLoss(mean).
    logp = jax.nn.log_softmax(outputs.astype(jnp.float32), axis=1)   # (N,C,H,W)
    picked = jnp.take_along_axis(logp, targets[:, None, :, :], axis=1)[:, 0]
    return -jnp.mean(picked)


if __name__ == "__main__":
    key = jax.random.PRNGKey(0)
    k1, k2 = jax.random.split(key)

    N, C, H, W = 2, 4, 16, 16
    outputs = jax.random.normal(k1, (N, C, H, W), dtype=jnp.float32)
    targets = jax.random.randint(k2, (N, H, W), 0, C, dtype=jnp.int32)

    loss = cross_entropy_loss_2d(outputs, targets)
    loss = jax.block_until_ready(loss)

    ref = jax.block_until_ready(_reference(outputs, targets))
    assert jnp.allclose(loss, ref, atol=1e-5, rtol=1e-5), (loss, ref)

    print("KERNEL_OK")
</pallas_src>

<mosaic_0001>
module attributes {stable_mosaic.version = 11 : i64} {
  func.func @_ce2d_kernel(%arg0: i32, %arg1: i32, %arg2: memref<2x4x256xf32, #tpu.memory_space<vmem>>, %arg3: memref<2x1x256xi32, #tpu.memory_space<vmem>>, %arg4: memref<1x1x1x1xf32, #tpu.memory_space<vmem>>) attributes {dimension_semantics = [#tpu.dimension_semantics<parallel>, #tpu.dimension_semantics<parallel>], iteration_bounds = array<i64: 1, 1>, scalar_prefetch = 0 : i64, scratch_operands = 0 : i64, tpu.core_type = #tpu.core_type<tc>, window_params = [{transform_indices = @transform_0, window_bounds = array<i64: 2, 4, 256>}, {transform_indices = @transform_1, window_bounds = array<i64: 2, 1, 256>}, {transform_indices = @transform_2, window_bounds = array<i64: 1, 1, 1, 1>}]} {
    %c0 = arith.constant 0 : index
    %c0_0 = arith.constant 0 : index
    %c0_1 = arith.constant 0 : index
    %0 = vector.load %arg2[%c0, %c0_0, %c0_1] : memref<2x4x256xf32, #tpu.memory_space<vmem>>, vector<2x4x256xf32>
    %c0_2 = arith.constant 0 : index
    %c0_3 = arith.constant 0 : index
    %c0_4 = arith.constant 0 : index
    %1 = vector.load %arg3[%c0_2, %c0_3, %c0_4] : memref<2x1x256xi32, #tpu.memory_space<vmem>>, vector<2x1x256xi32>
    %cst = arith.constant dense<0xFF800000> : vector<2x256xf32>
    %2 = vector.multi_reduction <maximumf>, %0, %cst [1] : vector<2x4x256xf32> to vector<2x256xf32>
    %3 = vector.shape_cast %2 : vector<2x256xf32> to vector<2x1x256xf32>
    %4 = vector.broadcast %3 : vector<2x1x256xf32> to vector<2x4x256xf32>
    %5 = arith.subf %0, %4 : vector<2x4x256xf32>
    %6 = math.exp %5 : vector<2x4x256xf32>
    %cst_5 = arith.constant dense<0.000000e+00> : vector<2x256xf32>
    %7 = vector.multi_reduction <add>, %6, %cst_5 [1] : vector<2x4x256xf32> to vector<2x256xf32>
    %8 = vector.shape_cast %7 : vector<2x256xf32> to vector<2x1x256xf32>
    %9 = math.log %8 : vector<2x1x256xf32>
    %10 = tpu.iota {dimensions = array<i32: 1>} : vector<1x4x1xi32>
    %11 = vector.broadcast %10 : vector<1x4x1xi32> to vector<2x4x256xi32>
    %12 = vector.broadcast %1 : vector<2x1x256xi32> to vector<2x4x256xi32>
    %13 = arith.cmpi eq, %11, %12 : vector<2x4x256xi32>
    %cst_6 = arith.constant 0.000000e+00 : f32
    %14 = vector.broadcast %cst_6 : f32 to vector<2x4x256xf32>
    %15 = arith.select %13, %0, %14 : vector<2x4x256xi1>, vector<2x4x256xf32>
    %cst_7 = arith.constant dense<0.000000e+00> : vector<2x256xf32>
    %16 = vector.multi_reduction <add>, %15, %cst_7 [1] : vector<2x4x256xf32> to vector<2x256xf32>
    %17 = vector.shape_cast %16 : vector<2x256xf32> to vector<2x1x256xf32>
    %c256_i32 = arith.constant 256 : i32
    %18 = arith.muli %arg1, %c256_i32 : i32
    %19 = tpu.iota {dimensions = array<i32: 2>} : vector<1x1x256xi32>
    %20 = vector.broadcast %18 : i32 to vector<1x1x256xi32>
    %21 = arith.addi %20, %19 : vector<1x1x256xi32>
    %c256_i32_8 = arith.constant 256 : i32
    %22 = vector.broadcast %c256_i32_8 : i32 to vector<1x1x256xi32>
    %23 = arith.cmpi slt, %21, %22 : vector<1x1x256xi32>
    %24 = arith.addf %3, %9 : vector<2x1x256xf32>
    %25 = arith.subf %24, %17 : vector<2x1x256xf32>
    %cst_9 = arith.constant 0.000000e+00 : f32
    %26 = vector.shape_cast %23 : vector<1x1x256xi1> to vector<1x1x256xi1>
    %27 = vector.broadcast %26 : vector<1x1x256xi1> to vector<2x1x256xi1>
    %28 = vector.broadcast %cst_9 : f32 to vector<2x1x256xf32>
    %29 = arith.select %27, %25, %28 : vector<2x1x256xi1>, vector<2x1x256xf32>
    %30 = vector.shape_cast %29 : vector<2x1x256xf32> to vector<1x2x1x256xf32>
    %cst_10 = arith.constant dense<0.000000e+00> : vector<1xf32>
    %31 = vector.multi_reduction <add>, %30, %cst_10 [1, 2, 3] : vector<1x2x1x256xf32> to vector<1xf32>
    %32 = vector.shape_cast %31 : vector<1xf32> to vector<1x1x1x1xf32>
    %33 = vector.extract %32[0, 0, 0, 0] : f32 from vector<1x1x1x1xf32>
    %34 = vector.broadcast %33 : f32 to vector<1x1x1x1xf32>
    %c0_11 = arith.constant 0 : index
    %c0_12 = arith.constant 0 : index
    %c0_13 = arith.constant 0 : index
    %c0_14 = arith.constant 0 : index
    %35 = vector.load %arg4[%c0_11, %c0_12, %c0_13, %c0_14] : memref<1x1x1x1xf32, #tpu.memory_space<vmem>>, vector<1x1x1x1xf32>
    tpu.vector_store %arg4[%c0_11, %c0_12, %c0_13, %c0_14], %34 {strides = array<i32>} : memref<1x1x1x1xf32, #tpu.memory_space<vmem>>, vector<1x1x1x1xf32>,
    return
  }
  func.func @transform_0(%arg0: i32, %arg1: i32) -> (i32, i32, i32) {
    %c0_i32 = arith.constant 0 : i32
    %c0_i32_0 = arith.constant 0 : i32
    return %arg0, %c0_i32, %arg1 : i32, i32, i32
  }
  func.func @transform_1(%arg0: i32, %arg1: i32) -> (i32, i32, i32) {
    %c0_i32 = arith.constant 0 : i32
    %c0_i32_0 = arith.constant 0 : i32
    return %arg0, %c0_i32, %arg1 : i32, i32, i32
  }
  func.func @transform_2(%arg0: i32, %arg1: i32) -> (i32, i32, i32, i32) {
    %c0_i32 = arith.constant 0 : i32
    %c0_i32_0 = arith.constant 0 : i32
    %c0_i32_1 = arith.constant 0 : i32
    return %arg0, %arg1, %c0_i32, %c0_i32_0 : i32, i32, i32, i32
  }
}

</mosaic_0001>

<bundles_post_ra>
// kernel: tpu_custom_call.1
= control target key start
LH: loop header
LB: loop body
LE: loop exit
PB: predicated region body
PF: predicated region fallthrough
CT: control target
= control target key end

     0   :  { %7 = vsyncpa [#allocation3], 0  ;;  %s431_s0 = inlined_call_operand.hbm [shape: f32[2,4,256], index: 0, kind: input, shape index: {}]   ;;  %s432_s1 = inlined_call_operand.hbm [shape: s32[2,1,256], index: 1, kind: input, shape index: {}]   ;;  %s433_s2 = inlined_call_operand.hbm [shape: f32[1,1,1,1], index: 2, kind: output, shape index: {}]  }
   0x1   :  { %8 = vsyncpa [#allocation6], 0 }
   0x2   :  { %9 = vsyncpa [#allocation4], 0  ;;  %s345_s9 = smov [#allocation2]   ;;  %s273_s13 = scalar_lea.hbm %s431_s0, 256 }
   0x3   :  { %s15_s10 = sshll.u32 %s345_s9, 4  ;;  %p274_p0 = scmp.ne.s32.totalorder %s431_s0, %s273_s13  ;;  %s16_s10 = int_to_ptr.vmem [resolvable:$true] %s15_s10 }
   0x4   :  { %p277_p1 = scmp.lt.u32.totalorder %s273_s13, %s431_s0 }
   0x6   :  { %p279_p2 = pnand %p277_p1, %p274_p0 }
   0x8   :  { %282 = shalt.err (!%p279_p2)
}
   0x9   :  { %s283_s18 = scalar_lea.vmem %s16_s10, 256  ;;  %p288_p4 = scmp.lt.s32.totalorder %s16_s10, %s16_s10 }
   0xa   :  { %p284_p3 = scmp.ne.s32.totalorder %s16_s10, %s283_s18  ;;  %p289_p5 = scmp.lt.s32.totalorder %s283_s18, %s283_s18 }
   0xc   :  { %p290_p6 = por %p289_p5, %p288_p4 }
   0xe   :  { %p291_p7 = pnand %p290_p6, %p284_p3 }
  0x10   :  { %294 = shalt.err (!%p291_p7)
}
  0x11   :  { %s346_s19 = smov 128   ;;  %s347_s20 = smov 8  }
  0x12   :  { %21 = dma.hbm_to_vmem [thread:$0]  %s431_s0, 256, %s16_s10, [#allocation3], %s346_s19, %s346_s19, %s347_s20  }
  0x13   :  { %s348_s23 = smov [#allocation5]   ;;  %s295_s27 = scalar_lea.hbm %s432_s1, 64 }
  0x14   :  { %s27_s24 = sshll.u32 %s348_s23, 4  ;;  %p296_p8 = scmp.ne.s32.totalorder %s432_s1, %s295_s27  ;;  %s28_s24 = int_to_ptr.vmem [resolvable:$true] %s27_s24 }
  0x15   :  { %p299_p9 = scmp.lt.u32.totalorder %s295_s27, %s432_s1 }
  0x17   :  { %p301_p10 = pnand %p299_p9, %p296_p8 }
  0x19   :  { %304 = shalt.err (!%p301_p10)
}
  0x1a   :  { %s305_s4 = scalar_lea.vmem %s28_s24, 64  ;;  %p310_p12 = scmp.lt.s32.totalorder %s28_s24, %s28_s24 }
  0x1b   :  { %p306_p11 = scmp.ne.s32.totalorder %s28_s24, %s305_s4  ;;  %p311_p13 = scmp.lt.s32.totalorder %s305_s4, %s305_s4 }
  0x1d   :  { %p312_p0 = por %p311_p13, %p310_p12 }
  0x1f   :  { %p313_p1 = pnand %p312_p0, %p306_p11 }
  0x21   :  { %316 = shalt.err (!%p313_p1)
}
  0x22   :  { %s349_s0 = smov 32   ;;  %s350_s5 = smov 2  }
  0x23   :  { %33 = dma.hbm_to_vmem [thread:$0]  %s432_s1, 64, %s28_s24, [#allocation6], %s349_s0, %s349_s0, %s350_s5  }
  0x24   :  { %339 = dma.done.wait [#allocation3], 256  }
  0x25   :  { %340 = vsyncadd [#allocation3], 4294967040 }
  0x26   :  { %341 = dma.done.wait [#allocation6], 64  }
  0x27   :  { %342 = vsyncadd [#allocation6], 4294967232  ;;  %vm50_vm0 = vcmask 1043456   ;;  %v40_v0 = vld [vmem:[#allocation2] sm:$0xff]  ;;  %v41_v1 = vld [vmem:[#allocation2 + $0x8] sm:$0xff]  ;;  %v135_v26 = vlaneseq  ;;  %vm214_vm5 = vcmask 1040384  }
  0x28   :  { %v46_v2 = vcombine.high %v40_v0, %v40_v0  ;;  %v47_v3 = vcombine.high %v41_v1, %v41_v1  ;;  %v51_v4 = vsel %vm50_vm0, %v40_v0, -inf  ;;  %v65_v5 = vsel %vm50_vm0, %v41_v1, -inf  ;;  %v42_v41 = vld [vmem:[#allocation5] sm:$0x3]  ;;  %v43_v42 = vld [vmem:[#allocation5 + $0x2] sm:$0x3] }
  0x29   :  { %v52_v6 = vrot.slane %v51_v4, 4  ;;  %v66_v7 = vrot.slane %v65_v5, 4  ;;  %v136_v35 = vshrl.u32 %v135_v26, 7  ;;  %s351_s1 = smov [#allocation7]   ;;  %vm232_vm6 = vcmask 0  }
  0x2a   :  { %v58_v8 = vsel %vm50_vm0, %v46_v2, -inf  ;;  %v72_v9 = vsel %vm50_vm0, %v47_v3, -inf  ;;  %s240_s8 = sshll.u32 %s351_s1, 4  ;;  %s241_s8 = int_to_ptr.vmem [resolvable:$true] %s240_s8 }
  0x2b   :  { %v53_v10 = vmax.f32 %v51_v4, %v52_v6  ;;  %v59_v11 = vrot.slane %v58_v8, 4  ;;  %v67_v12 = vmax.f32 %v65_v5, %v66_v7  ;;  %v73_v13 = vrot.slane %v72_v9, 4  ;;  %s317_s10 = scalar_lea.vmem %s241_s8, 16  ;;  %s321_s11 = scalar_lea.vmem %s241_s8, 32 }
  0x2c   :  { %v139_v40 = vsub.s32 0, %v136_v35  ;;  %v143_v43 = vsub.s32 1, %v136_v35  ;;  %p318_p2 = scmp.ne.s32.totalorder %s241_s8, %s317_s10  ;;  %p322_p3 = scmp.lt.s32.totalorder %s241_s8, %s241_s8 }
  0x2d   :  { %v54_v14 = vrot.slane %v53_v10, 2  ;;  %v60_v15 = vmax.f32 %v58_v8, %v59_v11  ;;  %v68_v16 = vrot.slane %v67_v12, 2  ;;  %v74_v17 = vmax.f32 %v72_v9, %v73_v13  ;;  %p323_p4 = scmp.lt.s32.totalorder %s321_s11, %s317_s10 }
  0x2e   :  { %v140_v44 = vrot.slane %v42_v41, %v139_v40  ;;  %v148_v45 = vrot.slane %v43_v42, %v139_v40  ;;  %v144_v46 = vrot.slane %v42_v41, %v143_v43  ;;  %v152_v47 = vrot.slane %v43_v42, %v143_v43 }
  0x2f   :  { %v55_v18 = vmax.f32 %v53_v10, %v54_v14  ;;  %v61_v19 = vrot.slane %v60_v15, 2  ;;  %v69_v20 = vmax.f32 %v67_v12, %v68_v16  ;;  %v75_v21 = vrot.slane %v74_v17, 2  ;;  %p324_p5 = por %p323_p4, %p322_p3 }
  0x30   :  { %vm153_vm1 = vcmp.eq.s32.totalorder %v136_v35, %v140_v44  ;;  %vm155_vm2 = vcmp.eq.s32.totalorder %v136_v35, %v148_v45  ;;  %vm154_vm3 = vcmp.eq.s32.totalorder %v136_v35, %v144_v46  ;;  %vm156_vm4 = vcmp.eq.s32.totalorder %v136_v35, %v152_v47 }
  0x31   :  { %v56_v22 = vrot.slane %v55_v18, 1  ;;  %v62_v23 = vmax.f32 %v60_v15, %v61_v19  ;;  %v70_v24 = vrot.slane %v69_v20, 1  ;;  %v76_v25 = vmax.f32 %v74_v17, %v75_v21  ;;  %p325_p6 = pnand %p324_p5, %p318_p2 }
  0x32   :  { %v157_v48 = vsel %vm153_vm1, %v40_v0, 0.0  ;;  %v159_v50 = vsel %vm155_vm2, %v41_v1, 0.0  ;;  %v158_v54 = vsel %vm154_vm3, %v46_v2, 0.0  ;;  %v160_v55 = vsel %vm156_vm4, %v47_v3, 0.0 }
  0x33   :  { %v395_v27 = vmax.f32 %v55_v18, %v56_v22  ;;  %v63_v28 = vrot.slane %v62_v23, 1  ;;  %v397_v29 = vmax.f32 %v69_v20, %v70_v24  ;;  %v77_v30 = vrot.slane %v76_v25, 1 }
  0x34   :  { %v161_v59 = vsel %vm50_vm0, %v157_v48, 0.0  ;;  %v175_v62 = vsel %vm50_vm0, %v159_v50, 0.0  ;;  %v168_v4 = vsel %vm50_vm0, %v158_v54, 0.0  ;;  %v182_v6 = vsel %vm50_vm0, %v160_v55, 0.0 }
  0x35   :  { %v399_v31 = vmax.f32 %v62_v23, %v63_v28  ;;  %v401_v32 = vmax.f32 %v76_v25, %v77_v30  ;;  %v162_v3 = vrot.slane %v161_v59, 4  ;;  %v176_v9 = vrot.slane %v175_v62, 4 }
  0x36   :  { %v169_v12 = vrot.slane %v168_v4, 4  ;;  %v183_v15 = vrot.slane %v182_v6, 4 }
  0x37   :  { %v83_v33 = vcombine.low %v395_v27, %v399_v31  ;;  %v84_v34 = vcombine.low %v397_v29, %v401_v32  ;;  %v163_v18 = vadd.f32 %v162_v3, %v161_v59  ;;  %v177_v21 = vadd.f32 %v176_v9, %v175_v62 }
  0x38   :  { %v170_v24 = vadd.f32 %v169_v12, %v168_v4  ;;  %v184_v28 = vadd.f32 %v183_v15, %v182_v6 }
  0x39   :  { %v87_v36 = vsub.f32 %v40_v0, %v83_v33  ;;  %v88_v37 = vsub.f32 %v41_v1, %v84_v34  ;;  %v164_v34 = vrot.slane %v163_v18, 2 }
  0x3b   :  { %v89_v38 = vmul.f32 1.442695, %v87_v36  ;;  %v91_v39 = vmul.f32 1.442695, %v88_v37  ;;  %v178_v36 = vrot.slane %v177_v21, 2  ;;  %v165_v40 = vadd.f32 %v164_v34, %v163_v18 }
  0x3d   :  { %261 = vpow2.f32 %v89_v38  ;;  %v171_v38 = vrot.slane %v170_v24, 2  ;;  %v179_v41 = vadd.f32 %v178_v36, %v177_v21  ;;  %v166_v44 = vrot.slane %v165_v40, 1 }
  0x3e   :  { %263 = vpow2.f32 %v91_v39  ;;  %v185_v39 = vrot.slane %v184_v28, 2 }
  0x3f   :  { %v172_v42 = vadd.f32 %v171_v38, %v170_v24  ;;  %v180_v45 = vrot.slane %v179_v41, 1 }
  0x40   :  { %v186_v43 = vadd.f32 %v185_v39, %v184_v28 }
  0x41   :  { %v173_v46 = vrot.slane %v172_v42, 1  ;;  %v181_v54 = vadd.f32 %v180_v45, %v179_v41 }
  0x42   :  { %v187_v48 = vrot.slane %v186_v43, 1 }
  0x47   :  { %v262_v49 = vpop.eup %261 }
  0x48   :  { %v264_v51 = vpop.eup %263  ;;  %v95_v52 = vcombine.high %v262_v49, %v262_v49  ;;  %v99_v53 = vsel %vm50_vm0, %v262_v49, 0.0 }
  0x49   :  { %v96_v56 = vcombine.high %v264_v51, %v264_v51  ;;  %v100_v57 = vrot.slane %v99_v53, 4  ;;  %v113_v58 = vsel %vm50_vm0, %v264_v51, 0.0  ;;  %v167_v51 = vadd.f32 %v166_v44, %v165_v40 }
  0x4a   :  { %v106_v60 = vsel %vm50_vm0, %v95_v52, 0.0  ;;  %v114_v61 = vrot.slane %v113_v58, 4 }
  0x4b   :  { %v101_v63 = vadd.f32 %v100_v57, %v99_v53  ;;  %v107_v0 = vrot.slane %v106_v60, 4  ;;  %v120_v1 = vsel %vm50_vm0, %v96_v56, 0.0  ;;  %v174_v57 = vadd.f32 %v173_v46, %v172_v42 }
  0x4c   :  { %v115_v5 = vadd.f32 %v114_v61, %v113_v58  ;;  %v121_v2 = vrot.slane %v120_v1, 4 }
  0x4d   :  { %v102_v7 = vrot.slane %v101_v63, 2  ;;  %v108_v8 = vadd.f32 %v107_v0, %v106_v60  ;;  %v188_v60 = vadd.f32 %v187_v48, %v186_v43 }
  0x4e   :  { %v116_v10 = vrot.slane %v115_v5, 2  ;;  %v122_v11 = vadd.f32 %v121_v2, %v120_v1 }
  0x4f   :  { %v103_v13 = vadd.f32 %v102_v7, %v101_v63  ;;  %v109_v14 = vrot.slane %v108_v8, 2 }
  0x50   :  { %v117_v16 = vadd.f32 %v116_v10, %v115_v5  ;;  %v123_v17 = vrot.slane %v122_v11, 2 }
  0x51   :  { %v104_v19 = vrot.slane %v103_v13, 1  ;;  %v110_v20 = vadd.f32 %v109_v14, %v108_v8 }
  0x52   :  { %v118_v22 = vrot.slane %v117_v16, 1  ;;  %v124_v23 = vadd.f32 %v123_v17, %v122_v11 }
  0x53   :  { %v105_v25 = vadd.f32 %v104_v19, %v103_v13  ;;  %v111_v26 = vrot.slane %v110_v20, 1 }
  0x54   :  { %v119_v30 = vadd.f32 %v118_v22, %v117_v16  ;;  %v125_v33 = vrot.slane %v124_v23, 1 }
  0x55   :  { %v112_v35 = vadd.f32 %v111_v26, %v110_v20  ;;  %265 = vlog2.f32 %v105_v25 }
  0x56   :  { %v126_v37 = vadd.f32 %v125_v33, %v124_v23  ;;  %267 = vlog2.f32 %v119_v30 }
  0x57   :  { %269 = vlog2.f32 %v112_v35 }
  0x58   :  { %271 = vlog2.f32 %v126_v37 }
  0x5f   :  { %v266_v47 = vpop.eup %265 }
  0x60   :  { %v268_v49 = vpop.eup %267  ;;  %v128_v50 = vmul.f32 0.6931472, %v266_v47 }
  0x61   :  { %v270_v52 = vpop.eup %269  ;;  %v132_v53 = vmul.f32 0.6931472, %v268_v49 }
  0x62   :  { %v272_v55 = vpop.eup %271  ;;  %v130_v56 = vmul.f32 0.6931472, %v270_v52  ;;  %v198_v58 = vadd.f32 %v128_v50, %v395_v27 }
  0x63   :  { %v134_v59 = vmul.f32 0.6931472, %v272_v55  ;;  %v200_v61 = vadd.f32 %v132_v53, %v397_v29 }
  0x64   :  { %v199_v62 = vadd.f32 %v130_v56, %v399_v31  ;;  %v202_v63 = vsub.f32 %v198_v58, %v167_v51 }
  0x65   :  { %v201_v0 = vadd.f32 %v134_v59, %v401_v32  ;;  %v204_v1 = vsub.f32 %v200_v61, %v181_v54 }
  0x66   :  { %v203_v4 = vsub.f32 %v199_v62, %v174_v57  ;;  %v215_v5 = vsel %vm214_vm5, %v202_v63, 0.0 }
  0x67   :  { %v205_v2 = vsub.f32 %v201_v0, %v188_v60  ;;  %v218_v6 = vsel %vm214_vm5, %v204_v1, 0.0 }
  0x68   :  { %v216_v3 = vsel %vm214_vm5, %v203_v4, 0.0 }
  0x69   :  { %v217_v7 = vadd.f32 %v216_v3, %v215_v5  ;;  %v220_v8 = vsel %vm214_vm5, %v205_v2, 0.0 }
  0x6b   :  { %v219_v9 = vadd.f32 %v218_v6, %v217_v7 }
  0x6d   :  { %v221_v27 = vadd.f32 %v220_v8, %v219_v9 }
  0x6f   :  { %222 = vadd.xlane.f32.xlu0 %v221_v27 }
  0xfc   :  { %v223_v10 = vpop.xlane.xlu0 %222 }
  0xfd   :  { %v224_v11 = vrot.slane %v223_v10, 4 }
  0xff   :  { %v225_v29 = vadd.f32 %v224_v11, %v223_v10 }
 0x101   :  { %v226_v12 = vrot.slane %v225_v29, 2 }
 0x103   :  { %v227_v13 = vadd.f32 %v226_v12, %v225_v29 }
 0x105   :  { %v228_v31 = vrot.slane %v227_v13, 1 }
 0x107   :  { %v229_v14 = vadd.f32 %v228_v31, %v227_v13 }
 0x109   :  { %250 = vpush %v229_v14 }
 0x13a   :  { %s251_s9 = spop %250 }
 0x13b   :  { %v231_v32 = vstv %s251_s9 }
 0x13c   :  { %233 = vst.msk [vmem:[#allocation7] sm:$0x1] %vm232_vm6, %v231_v32 }
 0x13d   :  { %328 = shalt.err (!%p325_p6)
}
 0x13e   :  { %s329_s14 = scalar_lea.hbm %s433_s2, 16 }
 0x13f   :  { %p330_p7 = scmp.ne.s32.totalorder %s433_s2, %s329_s14  ;;  %p333_p8 = scmp.lt.u32.totalorder %s329_s14, %s433_s2 }
 0x141   :  { %p335_p9 = pnand %p333_p8, %p330_p7 }
 0x143   :  { %338 = shalt.err (!%p335_p9)
}
 0x144   :  { %243 = dma.vmem_to_hbm [thread:$0]  %s241_s8, 16, %s433_s2, [#allocation4]  }
 0x145   :  { %343 = dma.done.wait [#allocation4], 16  }
 0x146   :  { %344 = vsyncadd [#allocation4], 4294967280 }
 0x147   :  { %247 = vsyncpa [#allocation3], 1 }
 0x148   :  { %248 = vsyncpa [#allocation6], 1 }
 0x149   :  { %249 = vsyncpa [#allocation4], 1 }

</bundles_post_ra>
